<compile_context>
chip_gen: v6e
topology: v6e:2x2x1
jax: 0.10.0
libtpu: 0.0.40
codegen_flags: <defaults>
</compile_context>

<pallas_src>
import jax
import jax.numpy as jnp
from jax import lax
from jax.experimental import pallas as pl
from jax.experimental.pallas import tpu as pltpu

SEQ_LEN = 20  # fixed by the module: linear1 in_features = 20 * embedding_dim


def _round_up(x, m):
    return ((x + m - 1) // m) * m


def _choose_tile_b(B):
    cap = 1024
    if B <= 256:
        return _round_up(B, 16)             # single grid step
    # Prefer >=2 grid steps so v7x's 2 TensorCores both get work.
    return min(_round_up(-(-B // 2), 16), cap)


# ----------------------------------------------------------------------------
# Kernels
# ----------------------------------------------------------------------------
def _fused_mlp_kernel(ids_ref, m_ref, b1_ref, w2_ref, b2_ref, out_ref):
    # ids_ref: (TB, 20) int32        m_ref:  (20*Vp, Hp) bf16  (emb@W1 per position)
    # b1_ref:  (1, Hp)  f32          w2_ref: (Hp, Cp)    bf16
    # b2_ref:  (1, Cp)  f32          out_ref:(TB, C)     f32
    tb = ids_ref.shape[0]
    vocab_p = m_ref.shape[0] // SEQ_LEN
    ids = ids_ref[...]
    tok = lax.broadcasted_iota(jnp.int32, (tb, vocab_p), 1)
    # Per-position one-hot blocks (each 128-lane aligned), concatenated lane-wise.
    oh = jnp.concatenate(
        [(ids[:, p:p + 1] == tok).astype(jnp.bfloat16) for p in range(SEQ_LEN)],
        axis=1)                                                   # (TB, 20*Vp) bf16
    # embedding gather + flatten + linear1, all as one lane-dense MXU matmul.
    h = jnp.dot(oh, m_ref[...], preferred_element_type=jnp.float32)
    h = jnp.maximum(h + b1_ref[...], 0.0)                         # bias + ReLU in f32
    y = jnp.dot(h.astype(jnp.bfloat16), w2_ref[...],
                preferred_element_type=jnp.float32) + b2_ref[...]
    out_ref[...] = y[:, :out_ref.shape[1]]                        # store only real classes


def _mlp_kernel(x_ref, w1_ref, b1_ref, w2_ref, b2_ref, out_ref):
    # Fallback (large vocab): x pre-gathered outside the kernel.
    h = jnp.dot(x_ref[...], w1_ref[...], preferred_element_type=jnp.float32)
    h = jnp.maximum(h + b1_ref[...], 0.0)
    y = jnp.dot(h.astype(jnp.bfloat16), w2_ref[...],
                preferred_element_type=jnp.float32) + b2_ref[...]
    out_ref[...] = y[:, :out_ref.shape[1]]


# ----------------------------------------------------------------------------
# One-time parameter preparation (hoisted out of the per-call path)
# ----------------------------------------------------------------------------
def prepare_params(embedding, w1, b1, w2, b2, *, fuse_gather=None):
    vocab, E = embedding.shape
    hidden = w1.shape[1]
    num_class = w2.shape[1]
    h_pad = _round_up(hidden, 128)
    c_pad = _round_up(num_class, 128)
    if fuse_gather is None:
        # Fused table is (20*Vp, Hp) bf16; keep it comfortably VMEM-resident.
        fuse_gather = vocab <= 1024

    params = dict(e_dim=E, hidden=hidden, num_class=num_class, fuse_gather=fuse_gather)
    params["b1"] = jnp.pad(b1.reshape(1, hidden),
                           ((0, 0), (0, h_pad - hidden))).astype(jnp.float32)
    params["w2"] = jnp.pad(w2, ((0, h_pad - hidden),
                                (0, c_pad - num_class))).astype(jnp.bfloat16)
    params["b2"] = jnp.pad(b2.reshape(1, num_class),
                           ((0, 0), (0, c_pad - num_class))).astype(jnp.float32)

    if fuse_gather:
        vocab_p = _round_up(vocab, 128)
        emb_p = jnp.pad(embedding.astype(jnp.float32), ((0, vocab_p - vocab), (0, 0)))
        w1_3d = w1.astype(jnp.float32).reshape(SEQ_LEN, E, hidden)
        # M[p, v, :] = emb[v, :] @ W1_p   (exact fusion of embedding + linear1)
        m = jnp.einsum("ve,peh->pvh", emb_p, w1_3d).reshape(SEQ_LEN * vocab_p, hidden)
        params["m"] = jnp.pad(m, ((0, 0), (0, h_pad - hidden))).astype(jnp.bfloat16)
    else:
        # Cast the (small) table once so the fallback gather streams bf16 rows.
        params["emb"] = embedding.astype(jnp.bfloat16)
        params["w1"] = jnp.pad(w1, ((0, 0), (0, h_pad - hidden))).astype(jnp.bfloat16)
    return params


# ----------------------------------------------------------------------------
# Forward
# ----------------------------------------------------------------------------
def mlp_forward(inputs, params, *, tile_b=None):
    """inputs: (B, 20) int32 token ids. Returns (B, num_class) f32 logits."""
    B, S = inputs.shape
    assert S == SEQ_LEN
    num_class = params["num_class"]
    h_pad = params["b1"].shape[1]
    c_pad = params["b2"].shape[1]

    if tile_b is None:
        tile_b = _choose_tile_b(B)
    tile_b = _round_up(tile_b, 16)
    b_pad = _round_up(B, tile_b)
    grid = (b_pad // tile_b,)

    cparams = pltpu.CompilerParams(
        dimension_semantics=("parallel",),
        # Worst-case footprint (tile_b=1024, fused path) is ~10 MiB; explicit
        # limit keeps plenty of headroom under v7x's 64 MiB VMEM.
        vmem_limit_bytes=48 * 1024 * 1024,
    )
    out_shape = jax.ShapeDtypeStruct((b_pad, num_class), jnp.float32)
    out_spec = pl.BlockSpec((tile_b, num_class), lambda i: (i, 0))  # 8 B/row writeback

    if params["fuse_gather"]:
        ids = inputs.astype(jnp.int32)
        if b_pad != B:
            ids = jnp.pad(ids, ((0, b_pad - B), (0, 0)))
        m = params["m"]
        out = pl.pallas_call(
            _fused_mlp_kernel,
            out_shape=out_shape,
            grid_spec=pltpu.PrefetchScalarGridSpec(
                num_scalar_prefetch=0,
                grid=grid,
                in_specs=[
                    pl.BlockSpec((tile_b, SEQ_LEN), lambda i: (i, 0)),  # ids (streamed)
                    pl.BlockSpec(m.shape, lambda i: (0, 0)),            # fused emb@W1 table
                    pl.BlockSpec((1, h_pad), lambda i: (0, 0)),         # b1
                    pl.BlockSpec((h_pad, c_pad), lambda i: (0, 0)),     # W2 (bf16)
                    pl.BlockSpec((1, c_pad), lambda i: (0, 0)),         # b2
                ],
                out_specs=out_spec,
            ),
            compiler_params=cparams,
        )(ids, m, params["b1"], params["w2"], params["b2"])
    else:
        # TODO(synk): large-vocab path still round-trips the gathered activations
        # through HBM; fuse via scalar-prefetched ids + per-row DMA gather instead.
        in_dim = SEQ_LEN * params["e_dim"]
        x = jnp.take(params["emb"], inputs, axis=0).reshape(B, in_dim)
        if b_pad != B:
            x = jnp.pad(x, ((0, b_pad - B), (0, 0)))
        out = pl.pallas_call(
            _mlp_kernel,
            out_shape=out_shape,
            grid_spec=pltpu.PrefetchScalarGridSpec(
                num_scalar_prefetch=0,
                grid=grid,
                in_specs=[
                    pl.BlockSpec((tile_b, in_dim), lambda i: (i, 0)),   # x tile (streamed)
                    pl.BlockSpec((in_dim, h_pad), lambda i: (0, 0)),    # W1 (bf16)
                    pl.BlockSpec((1, h_pad), lambda i: (0, 0)),         # b1
                    pl.BlockSpec((h_pad, c_pad), lambda i: (0, 0)),     # W2 (bf16)
                    pl.BlockSpec((1, c_pad), lambda i: (0, 0)),         # b2
                ],
                out_specs=out_spec,
            ),
            compiler_params=cparams,
        )(x, params["w1"], params["b1"], params["w2"], params["b2"])

    return out[:B]


if __name__ == "__main__":
    # Small, module-consistent shapes.
    vocab_len = 128
    embedding_dim = 32
    hidden_dim = 64
    num_class = 2
    batch = 16

    key = jax.random.PRNGKey(0)
    k_emb, k_w1, k_b1, k_w2, k_b2, k_in = jax.random.split(key, 6)

    embedding = jax.random.normal(k_emb, (vocab_len, embedding_dim), jnp.float32)
    w1 = jax.random.normal(k_w1, (SEQ_LEN * embedding_dim, hidden_dim), jnp.float32) * 0.05
    b1 = jax.random.normal(k_b1, (hidden_dim,), jnp.float32) * 0.05
    w2 = jax.random.normal(k_w2, (hidden_dim, num_class), jnp.float32) * 0.05
    b2 = jax.random.normal(k_b2, (num_class,), jnp.float32) * 0.05

    inputs = jax.random.randint(k_in, (batch, SEQ_LEN), 0, vocab_len, dtype=jnp.int32)

    params = prepare_params(embedding, w1, b1, w2, b2)   # one-time padding/cast/fusion
    out = mlp_forward(inputs, params)
    out = jax.block_until_ready(out)

    # Pure-JAX f32 reference of the original module forward.
    x_ref = jnp.take(embedding, inputs, axis=0).reshape(batch, -1)
    h_ref = jnp.maximum(x_ref @ w1 + b1, 0.0)
    ref = h_ref @ w2 + b2

    assert out.shape == (batch, num_class)
    assert jnp.allclose(out, ref, atol=2e-2, rtol=2e-2)

    print("KERNEL_OK")
</pallas_src>

<mosaic_0001>
module attributes {stable_mosaic.version = 11 : i64} {
  func.func @_fused_mlp_kernel(%arg0: i32, %arg1: memref<16x20xi32, #tpu.memory_space<vmem>>, %arg2: memref<2560x128xbf16, #tpu.memory_space<vmem>>, %arg3: memref<1x128xf32, #tpu.memory_space<vmem>>, %arg4: memref<128x128xbf16, #tpu.memory_space<vmem>>, %arg5: memref<1x128xf32, #tpu.memory_space<vmem>>, %arg6: memref<16x2xf32, #tpu.memory_space<vmem>>) attributes {dimension_semantics = [#tpu.dimension_semantics<parallel>], iteration_bounds = array<i64: 1>, scalar_prefetch = 0 : i64, scratch_operands = 0 : i64, tpu.core_type = #tpu.core_type<tc>, window_params = [{transform_indices = @transform_0, window_bounds = array<i64: 16, 20>}, {pipeline_mode = #tpu.pipeline_mode<synchronous>, transform_indices = @transform_1, window_bounds = array<i64: 2560, 128>}, {pipeline_mode = #tpu.pipeline_mode<synchronous>, transform_indices = @transform_2, window_bounds = array<i64: 1, 128>}, {pipeline_mode = #tpu.pipeline_mode<synchronous>, transform_indices = @transform_3, window_bounds = array<i64: 128, 128>}, {pipeline_mode = #tpu.pipeline_mode<synchronous>, transform_indices = @transform_4, window_bounds = array<i64: 1, 128>}, {transform_indices = @transform_5, window_bounds = array<i64: 16, 2>}]} {
    %c0 = arith.constant 0 : index
    %c0_0 = arith.constant 0 : index
    %0 = vector.load %arg1[%c0, %c0_0] : memref<16x20xi32, #tpu.memory_space<vmem>>, vector<16x20xi32>
    %1 = tpu.iota {dimensions = array<i32: 1>} : vector<16x128xi32>
    %2 = vector.extract_strided_slice %0 {offsets = [0, 0], sizes = [16, 1], strides = [1, 1]} : vector<16x20xi32> to vector<16x1xi32>
    %3 = vector.broadcast %2 : vector<16x1xi32> to vector<16x128xi32>
    %4 = arith.cmpi eq, %3, %1 : vector<16x128xi32>
    %5 = arith.extui %4 : vector<16x128xi1> to vector<16x128xi32>
    %6 = arith.sitofp %5 : vector<16x128xi32> to vector<16x128xf32>
    %7 = arith.truncf %6 : vector<16x128xf32> to vector<16x128xbf16>
    %8 = vector.extract_strided_slice %0 {offsets = [0, 1], sizes = [16, 1], strides = [1, 1]} : vector<16x20xi32> to vector<16x1xi32>
    %9 = vector.broadcast %8 : vector<16x1xi32> to vector<16x128xi32>
    %10 = arith.cmpi eq, %9, %1 : vector<16x128xi32>
    %11 = arith.extui %10 : vector<16x128xi1> to vector<16x128xi32>
    %12 = arith.sitofp %11 : vector<16x128xi32> to vector<16x128xf32>
    %13 = arith.truncf %12 : vector<16x128xf32> to vector<16x128xbf16>
    %14 = vector.extract_strided_slice %0 {offsets = [0, 2], sizes = [16, 1], strides = [1, 1]} : vector<16x20xi32> to vector<16x1xi32>
    %15 = vector.broadcast %14 : vector<16x1xi32> to vector<16x128xi32>
    %16 = arith.cmpi eq, %15, %1 : vector<16x128xi32>
    %17 = arith.extui %16 : vector<16x128xi1> to vector<16x128xi32>
    %18 = arith.sitofp %17 : vector<16x128xi32> to vector<16x128xf32>
    %19 = arith.truncf %18 : vector<16x128xf32> to vector<16x128xbf16>
    %20 = vector.extract_strided_slice %0 {offsets = [0, 3], sizes = [16, 1], strides = [1, 1]} : vector<16x20xi32> to vector<16x1xi32>
    %21 = vector.broadcast %20 : vector<16x1xi32> to vector<16x128xi32>
    %22 = arith.cmpi eq, %21, %1 : vector<16x128xi32>
    %23 = arith.extui %22 : vector<16x128xi1> to vector<16x128xi32>
    %24 = arith.sitofp %23 : vector<16x128xi32> to vector<16x128xf32>
    %25 = arith.truncf %24 : vector<16x128xf32> to vector<16x128xbf16>
    %26 = vector.extract_strided_slice %0 {offsets = [0, 4], sizes = [16, 1], strides = [1, 1]} : vector<16x20xi32> to vector<16x1xi32>
    %27 = vector.broadcast %26 : vector<16x1xi32> to vector<16x128xi32>
    %28 = arith.cmpi eq, %27, %1 : vector<16x128xi32>
    %29 = arith.extui %28 : vector<16x128xi1> to vector<16x128xi32>
    %30 = arith.sitofp %29 : vector<16x128xi32> to vector<16x128xf32>
    %31 = arith.truncf %30 : vector<16x128xf32> to vector<16x128xbf16>
    %32 = vector.extract_strided_slice %0 {offsets = [0, 5], sizes = [16, 1], strides = [1, 1]} : vector<16x20xi32> to vector<16x1xi32>
    %33 = vector.broadcast %32 : vector<16x1xi32> to vector<16x128xi32>
    %34 = arith.cmpi eq, %33, %1 : vector<16x128xi32>
    %35 = arith.extui %34 : vector<16x128xi1> to vector<16x128xi32>
    %36 = arith.sitofp %35 : vector<16x128xi32> to vector<16x128xf32>
    %37 = arith.truncf %36 : vector<16x128xf32> to vector<16x128xbf16>
    %38 = vector.extract_strided_slice %0 {offsets = [0, 6], sizes = [16, 1], strides = [1, 1]} : vector<16x20xi32> to vector<16x1xi32>
    %39 = vector.broadcast %38 : vector<16x1xi32> to vector<16x128xi32>
    %40 = arith.cmpi eq, %39, %1 : vector<16x128xi32>
    %41 = arith.extui %40 : vector<16x128xi1> to vector<16x128xi32>
    %42 = arith.sitofp %41 : vector<16x128xi32> to vector<16x128xf32>
    %43 = arith.truncf %42 : vector<16x128xf32> to vector<16x128xbf16>
    %44 = vector.extract_strided_slice %0 {offsets = [0, 7], sizes = [16, 1], strides = [1, 1]} : vector<16x20xi32> to vector<16x1xi32>
    %45 = vector.broadcast %44 : vector<16x1xi32> to vector<16x128xi32>
    %46 = arith.cmpi eq, %45, %1 : vector<16x128xi32>
    %47 = arith.extui %46 : vector<16x128xi1> to vector<16x128xi32>
    %48 = arith.sitofp %47 : vector<16x128xi32> to vector<16x128xf32>
    %49 = arith.truncf %48 : vector<16x128xf32> to vector<16x128xbf16>
    %50 = vector.extract_strided_slice %0 {offsets = [0, 8], sizes = [16, 1], strides = [1, 1]} : vector<16x20xi32> to vector<16x1xi32>
    %51 = vector.broadcast %50 : vector<16x1xi32> to vector<16x128xi32>
    %52 = arith.cmpi eq, %51, %1 : vector<16x128xi32>
    %53 = arith.extui %52 : vector<16x128xi1> to vector<16x128xi32>
    %54 = arith.sitofp %53 : vector<16x128xi32> to vector<16x128xf32>
    %55 = arith.truncf %54 : vector<16x128xf32> to vector<16x128xbf16>
    %56 = vector.extract_strided_slice %0 {offsets = [0, 9], sizes = [16, 1], strides = [1, 1]} : vector<16x20xi32> to vector<16x1xi32>
    %57 = vector.broadcast %56 : vector<16x1xi32> to vector<16x128xi32>
    %58 = arith.cmpi eq, %57, %1 : vector<16x128xi32>
    %59 = arith.extui %58 : vector<16x128xi1> to vector<16x128xi32>
    %60 = arith.sitofp %59 : vector<16x128xi32> to vector<16x128xf32>
    %61 = arith.truncf %60 : vector<16x128xf32> to vector<16x128xbf16>
    %62 = vector.extract_strided_slice %0 {offsets = [0, 10], sizes = [16, 1], strides = [1, 1]} : vector<16x20xi32> to vector<16x1xi32>
    %63 = vector.broadcast %62 : vector<16x1xi32> to vector<16x128xi32>
    %64 = arith.cmpi eq, %63, %1 : vector<16x128xi32>
    %65 = arith.extui %64 : vector<16x128xi1> to vector<16x128xi32>
    %66 = arith.sitofp %65 : vector<16x128xi32> to vector<16x128xf32>
    %67 = arith.truncf %66 : vector<16x128xf32> to vector<16x128xbf16>
    %68 = vector.extract_strided_slice %0 {offsets = [0, 11], sizes = [16, 1], strides = [1, 1]} : vector<16x20xi32> to vector<16x1xi32>
    %69 = vector.broadcast %68 : vector<16x1xi32> to vector<16x128xi32>
    %70 = arith.cmpi eq, %69, %1 : vector<16x128xi32>
    %71 = arith.extui %70 : vector<16x128xi1> to vector<16x128xi32>
    %72 = arith.sitofp %71 : vector<16x128xi32> to vector<16x128xf32>
    %73 = arith.truncf %72 : vector<16x128xf32> to vector<16x128xbf16>
    %74 = vector.extract_strided_slice %0 {offsets = [0, 12], sizes = [16, 1], strides = [1, 1]} : vector<16x20xi32> to vector<16x1xi32>
    %75 = vector.broadcast %74 : vector<16x1xi32> to vector<16x128xi32>
    %76 = arith.cmpi eq, %75, %1 : vector<16x128xi32>
    %77 = arith.extui %76 : vector<16x128xi1> to vector<16x128xi32>
    %78 = arith.sitofp %77 : vector<16x128xi32> to vector<16x128xf32>
    %79 = arith.truncf %78 : vector<16x128xf32> to vector<16x128xbf16>
    %80 = vector.extract_strided_slice %0 {offsets = [0, 13], sizes = [16, 1], strides = [1, 1]} : vector<16x20xi32> to vector<16x1xi32>
    %81 = vector.broadcast %80 : vector<16x1xi32> to vector<16x128xi32>
    %82 = arith.cmpi eq, %81, %1 : vector<16x128xi32>
    %83 = arith.extui %82 : vector<16x128xi1> to vector<16x128xi32>
    %84 = arith.sitofp %83 : vector<16x128xi32> to vector<16x128xf32>
    %85 = arith.truncf %84 : vector<16x128xf32> to vector<16x128xbf16>
    %86 = vector.extract_strided_slice %0 {offsets = [0, 14], sizes = [16, 1], strides = [1, 1]} : vector<16x20xi32> to vector<16x1xi32>
    %87 = vector.broadcast %86 : vector<16x1xi32> to vector<16x128xi32>
    %88 = arith.cmpi eq, %87, %1 : vector<16x128xi32>
    %89 = arith.extui %88 : vector<16x128xi1> to vector<16x128xi32>
    %90 = arith.sitofp %89 : vector<16x128xi32> to vector<16x128xf32>
    %91 = arith.truncf %90 : vector<16x128xf32> to vector<16x128xbf16>
    %92 = vector.extract_strided_slice %0 {offsets = [0, 15], sizes = [16, 1], strides = [1, 1]} : vector<16x20xi32> to vector<16x1xi32>
    %93 = vector.broadcast %92 : vector<16x1xi32> to vector<16x128xi32>
    %94 = arith.cmpi eq, %93, %1 : vector<16x128xi32>
    %95 = arith.extui %94 : vector<16x128xi1> to vector<16x128xi32>
    %96 = arith.sitofp %95 : vector<16x128xi32> to vector<16x128xf32>
    %97 = arith.truncf %96 : vector<16x128xf32> to vector<16x128xbf16>
    %98 = vector.extract_strided_slice %0 {offsets = [0, 16], sizes = [16, 1], strides = [1, 1]} : vector<16x20xi32> to vector<16x1xi32>
    %99 = vector.broadcast %98 : vector<16x1xi32> to vector<16x128xi32>
    %100 = arith.cmpi eq, %99, %1 : vector<16x128xi32>
    %101 = arith.extui %100 : vector<16x128xi1> to vector<16x128xi32>
    %102 = arith.sitofp %101 : vector<16x128xi32> to vector<16x128xf32>
    %103 = arith.truncf %102 : vector<16x128xf32> to vector<16x128xbf16>
    %104 = vector.extract_strided_slice %0 {offsets = [0, 17], sizes = [16, 1], strides = [1, 1]} : vector<16x20xi32> to vector<16x1xi32>
    %105 = vector.broadcast %104 : vector<16x1xi32> to vector<16x128xi32>
    %106 = arith.cmpi eq, %105, %1 : vector<16x128xi32>
    %107 = arith.extui %106 : vector<16x128xi1> to vector<16x128xi32>
    %108 = arith.sitofp %107 : vector<16x128xi32> to vector<16x128xf32>
    %109 = arith.truncf %108 : vector<16x128xf32> to vector<16x128xbf16>
    %110 = vector.extract_strided_slice %0 {offsets = [0, 18], sizes = [16, 1], strides = [1, 1]} : vector<16x20xi32> to vector<16x1xi32>
    %111 = vector.broadcast %110 : vector<16x1xi32> to vector<16x128xi32>
    %112 = arith.cmpi eq, %111, %1 : vector<16x128xi32>
    %113 = arith.extui %112 : vector<16x128xi1> to vector<16x128xi32>
    %114 = arith.sitofp %113 : vector<16x128xi32> to vector<16x128xf32>
    %115 = arith.truncf %114 : vector<16x128xf32> to vector<16x128xbf16>
    %116 = vector.extract_strided_slice %0 {offsets = [0, 19], sizes = [16, 1], strides = [1, 1]} : vector<16x20xi32> to vector<16x1xi32>
    %117 = vector.broadcast %116 : vector<16x1xi32> to vector<16x128xi32>
    %118 = arith.cmpi eq, %117, %1 : vector<16x128xi32>
    %119 = arith.extui %118 : vector<16x128xi1> to vector<16x128xi32>
    %120 = arith.sitofp %119 : vector<16x128xi32> to vector<16x128xf32>
    %121 = arith.truncf %120 : vector<16x128xf32> to vector<16x128xbf16>
    %122 = tpu.concatenate %7, %13, %19, %25, %31, %37, %43, %49, %55, %61, %67, %73, %79, %85, %91, %97 in 1 : vector<16x128xbf16>, vector<16x128xbf16>, vector<16x128xbf16>, vector<16x128xbf16>, vector<16x128xbf16>, vector<16x128xbf16>, vector<16x128xbf16>, vector<16x128xbf16>, vector<16x128xbf16>, vector<16x128xbf16>, vector<16x128xbf16>, vector<16x128xbf16>, vector<16x128xbf16>, vector<16x128xbf16>, vector<16x128xbf16>, vector<16x128xbf16> -> vector<16x2048xbf16>
    %123 = tpu.concatenate %103, %109, %115, %121 in 1 : vector<16x128xbf16>, vector<16x128xbf16>, vector<16x128xbf16>, vector<16x128xbf16> -> vector<16x512xbf16>
    %124 = tpu.concatenate %122, %123 in 1 : vector<16x2048xbf16>, vector<16x512xbf16> -> vector<16x2560xbf16>
    %c0_1 = arith.constant 0 : index
    %c0_2 = arith.constant 0 : index
    %125 = vector.load %arg2[%c0_1, %c0_2] : memref<2560x128xbf16, #tpu.memory_space<vmem>>, vector<2560x128xbf16>
    %cst = arith.constant dense<0.000000e+00> : vector<16x128xf32>
    %126 = tpu.matmul %124, %125, %cst {dimension_numbers = #tpu.dot_dimension_numbers<[1], [0], [0], [1], [0, 0, 1, 1], [], []>} : vector<16x2560xbf16>, vector<2560x128xbf16>, vector<16x128xf32> -> vector<16x128xf32>
    %c0_3 = arith.constant 0 : index
    %c0_4 = arith.constant 0 : index
    %127 = vector.load %arg3[%c0_3, %c0_4] : memref<1x128xf32, #tpu.memory_space<vmem>>, vector<1x128xf32>
    %128 = vector.broadcast %127 : vector<1x128xf32> to vector<16x128xf32>
    %129 = arith.addf %126, %128 : vector<16x128xf32>
    %cst_5 = arith.constant 0.000000e+00 : f32
    %130 = vector.broadcast %cst_5 : f32 to vector<16x128xf32>
    %131 = arith.maximumf %129, %130 : vector<16x128xf32>
    %132 = arith.truncf %131 : vector<16x128xf32> to vector<16x128xbf16>
    %c0_6 = arith.constant 0 : index
    %c0_7 = arith.constant 0 : index
    %133 = vector.load %arg4[%c0_6, %c0_7] : memref<128x128xbf16, #tpu.memory_space<vmem>>, vector<128x128xbf16>
    %cst_8 = arith.constant dense<0.000000e+00> : vector<16x128xf32>
    %134 = tpu.matmul %132, %133, %cst_8 {dimension_numbers = #tpu.dot_dimension_numbers<[1], [0], [0], [1], [0, 0, 1, 1], [], []>} : vector<16x128xbf16>, vector<128x128xbf16>, vector<16x128xf32> -> vector<16x128xf32>
    %c0_9 = arith.constant 0 : index
    %c0_10 = arith.constant 0 : index
    %135 = vector.load %arg5[%c0_9, %c0_10] : memref<1x128xf32, #tpu.memory_space<vmem>>, vector<1x128xf32>
    %136 = vector.broadcast %135 : vector<1x128xf32> to vector<16x128xf32>
    %137 = arith.addf %134, %136 : vector<16x128xf32>
    %138 = vector.extract_strided_slice %137 {offsets = [0, 0], sizes = [16, 2], strides = [1, 1]} : vector<16x128xf32> to vector<16x2xf32>
    %c0_11 = arith.constant 0 : index
    %c0_12 = arith.constant 0 : index
    %139 = vector.load %arg6[%c0_11, %c0_12] : memref<16x2xf32, #tpu.memory_space<vmem>>, vector<16x2xf32>
    tpu.vector_store %arg6[%c0_11, %c0_12], %138 {strides = array<i32>} : memref<16x2xf32, #tpu.memory_space<vmem>>, vector<16x2xf32>,
    return
  }
  func.func @transform_0(%arg0: i32) -> (i32, i32) {
    %c0_i32 = arith.constant 0 : i32
    %c0_i32_0 = arith.constant 0 : i32
    return %arg0, %c0_i32 : i32, i32
  }
  func.func @transform_1(%arg0: i32) -> (i32, i32) {
    %c0_i32 = arith.constant 0 : i32
    %c0_i32_0 = arith.constant 0 : i32
    %c0_i32_1 = arith.constant 0 : i32
    return %c0_i32, %c0_i32_0 : i32, i32
  }
  func.func @transform_2(%arg0: i32) -> (i32, i32) {
    %c0_i32 = arith.constant 0 : i32
    %c0_i32_0 = arith.constant 0 : i32
    %c0_i32_1 = arith.constant 0 : i32
    return %c0_i32, %c0_i32_0 : i32, i32
  }
  func.func @transform_3(%arg0: i32) -> (i32, i32) {
    %c0_i32 = arith.constant 0 : i32
    %c0_i32_0 = arith.constant 0 : i32
    %c0_i32_1 = arith.constant 0 : i32
    return %c0_i32, %c0_i32_0 : i32, i32
  }
  func.func @transform_4(%arg0: i32) -> (i32, i32) {
    %c0_i32 = arith.constant 0 : i32
    %c0_i32_0 = arith.constant 0 : i32
    %c0_i32_1 = arith.constant 0 : i32
    return %c0_i32, %c0_i32_0 : i32, i32
  }
  func.func @transform_5(%arg0: i32) -> (i32, i32) {
    %c0_i32 = arith.constant 0 : i32
    %c0_i32_0 = arith.constant 0 : i32
    return %arg0, %c0_i32 : i32, i32
  }
}

</mosaic_0001>

<bundles_post_ra>
// kernel: tpu_custom_call.1
= control target key start
LH: loop header
LB: loop body
LE: loop exit
PB: predicated region body
PF: predicated region fallthrough
CT: control target
= control target key end

     0   :  { %10 = vsyncpa [#allocation3], 0  ;;  %s3139_s0 = inlined_call_operand.hbm [shape: s32[16,20], index: 0, kind: input, shape index: {}]   ;;  %s3140_s1 = inlined_call_operand.hbm [shape: bf16[2560,128], index: 1, kind: input, shape index: {}]   ;;  %s3141_s2 = inlined_call_operand.vmem [shape: f32[1,128], index: 2, kind: input, shape index: {}]   ;;  %s3142_s3 = inlined_call_operand.hbm [shape: bf16[128,128], index: 3, kind: input, shape index: {}]   ;;  %s3143_s4 = inlined_call_operand.vmem [shape: f32[1,128], index: 4, kind: input, shape index: {}]   ;;  %s3144_s5 = inlined_call_operand.vmem [shape: f32[16,2], index: 5, kind: output, shape index: {}]  }
   0x1   :  { %11 = vsyncpa [#allocation5], 0  ;;  %s2940_s18 = smov [#allocation4]  }
   0x2   :  { %s29_s19 = sshll.u32 %s2940_s18, 4  ;;  %s30_s19 = int_to_ptr.vmem [resolvable:$true] %s29_s19 }
   0x3   :  { %s2884_s20 = scalar_lea.vmem %s30_s19, 20480  ;;  %p2889_p1 = scmp.lt.s32.totalorder %s30_s19, %s30_s19 }
   0x4   :  { %p2885_p0 = scmp.ne.s32.totalorder %s30_s19, %s2884_s20  ;;  %p2890_p2 = scmp.lt.s32.totalorder %s2884_s20, %s2884_s20 }
   0x6   :  { %p2891_p3 = por %p2890_p2, %p2889_p1 }
   0x8   :  { %p2892_p4 = pnand %p2891_p3, %p2885_p0 }
   0xa   :  { %2895 = shalt.err (!%p2892_p4)
}
   0xb   :  { %s2941_s21 = smov 64   ;;  %s2942_s22 = smov 4  }
   0xc   :  { %35 = dma.hbm_to_vmem [thread:$0]  %s3140_s1, 20480, %s30_s19, [#allocation5], %s2941_s21, %s2941_s21, %s2942_s22  }
   0xd   :  { %s2943_s25 = smov [#allocation2]  }
   0xe   :  { %s17_s26 = sshll.u32 %s2943_s25, 4  ;;  %s18_s26 = int_to_ptr.vmem [resolvable:$true] %s17_s26 }
   0xf   :  { %s2904_s27 = scalar_lea.vmem %s18_s26, 256  ;;  %p2909_p6 = scmp.lt.s32.totalorder %s18_s26, %s18_s26 }
  0x10   :  { %p2905_p5 = scmp.ne.s32.totalorder %s18_s26, %s2904_s27  ;;  %p2910_p7 = scmp.lt.s32.totalorder %s2904_s27, %s2904_s27 }
  0x12   :  { %p2911_p8 = por %p2910_p7, %p2909_p6 }
  0x14   :  { %p2912_p9 = pnand %p2911_p8, %p2905_p5 }
  0x16   :  { %2915 = shalt.err (!%p2912_p9)
}
  0x17   :  { %s2944_s28 = smov 128   ;;  %s2945_s29 = smov 8  }
  0x18   :  { %23 = dma.hbm_to_vmem [thread:$0]  %s3139_s0, 256, %s18_s26, [#allocation3], %s2944_s28, %s2944_s28, %s2945_s29  }
  0x19   :  { %s2946_s7 = smov [#allocation6]  }
  0x1a   :  { %s43_s8 = sshll.u32 %s2946_s7, 4  ;;  %s44_s8 = int_to_ptr.vmem [resolvable:$true] %s43_s8 }
  0x1b   :  { %s2924_s1 = scalar_lea.vmem %s44_s8, 1024  ;;  %p2929_p11 = scmp.lt.s32.totalorder %s44_s8, %s44_s8 }
  0x1c   :  { %p2925_p10 = scmp.ne.s32.totalorder %s44_s8, %s2924_s1  ;;  %p2930_p12 = scmp.lt.s32.totalorder %s2924_s1, %s2924_s1 }
  0x1e   :  { %p2931_p13 = por %p2930_p12, %p2929_p11 }
  0x20   :  { %p2932_p0 = pnand %p2931_p13, %p2925_p10 }
  0x22   :  { %2935 = shalt.err (!%p2932_p0)
}
  0x23   :  { %49 = dma.hbm_to_vmem [thread:$0]  %s3142_s3, 1024, %s44_s8, [#allocation5], %s2941_s21, %s2941_s21, %s2942_s22  }
  0x24   :  { %2936 = dma.done.wait [#allocation3], 256  }
  0x25   :  { %2937 = vsyncadd [#allocation3], 4294967040 }
  0x26   :  { %2938 = dma.done.wait [#allocation5], 21504  }
  0x27   :  { %2939 = vsyncadd [#allocation5], 4294945792  ;;  %v2947_v0 = vmov 1   ;;  %v2948_v1 = vmov 0   ;;  %v3009_v2 = vld [vmem:[#allocation2] sm:$0xff]  ;;  %v3011_v3 = vld [vmem:[#allocation2 + $0x8] sm:$0xff]  ;;  %v64_v56 = vlaneseq }
  0x28   :  { %2676 = vset.pattern.permute.xlu0 %v2947_v0  ;;  %2677 = vset.pattern.permute.xlu1 %v2948_v1  ;;  %v2708_v4 = vld [vmem:[#allocation4 + $0x78] sm:$0xff]   ;;  %v2710_v6 = vld [vmem:[#allocation4 + $0x70] sm:$0xff]   ;;  %v2712_v8 = vld [vmem:[#allocation4 + $0x68] sm:$0xff]   ;;  %v2949_v12 = vmov 3   ;;  %v2950_v18 = vmov 2   ;;  %v2951_v23 = vmov 5  }
  0x29   :  { %67 = vperm.xlu1 %2677, %v3009_v2   ;;  %80 = vperm.xlu0 %2676, %v3009_v2   ;;  %v2709_v5 = vld [vmem:[#allocation4 + $0x38] sm:$0xff]   ;;  %v2711_v7 = vld [vmem:[#allocation4 + $0x30] sm:$0xff]   ;;  %v2713_v9 = vld [vmem:[#allocation4 + $0x28] sm:$0xff]   ;;  %v2952_v24 = vmov 4   ;;  %v2953_v30 = vmov 7   ;;  %v2954_v35 = vmov 9  }
  0x2a   :  { %2397 = vmatprep.subr.bf16.mxu0 %v2708_v4  ;;  %v2714_v10 = vld [vmem:[#allocation4 + $0xf8] sm:$0xff]   ;;  %v2716_v13 = vld [vmem:[#allocation4 + $0x60] sm:$0xff]   ;;  %v2718_v15 = vld [vmem:[#allocation4 + $0xf0] sm:$0xff]   ;;  %v2955_v40 = vmov 8   ;;  %v2956_v43 = vmov 6   ;;  %v2957_v44 = vmov 10  }
  0x2b   :  { %2398 = vmatpush3.bf16.msra.mxu0 %v2709_v5  ;;  %v2715_v11 = vld [vmem:[#allocation4 + $0xb8] sm:$0xff]   ;;  %v2717_v14 = vld [vmem:[#allocation4 + $0x20] sm:$0xff]   ;;  %2419 = vmatprep.subr.bf16.mxu1 %v2714_v10  ;;  %v2719_v16 = vld [vmem:[#allocation4 + $0xb0] sm:$0xff]   ;;  %v2958_v47 = vmov 13   ;;  %v2959_v48 = vmov 15   ;;  %v2960_v49 = vmov 14  }
  0x2c   :  { %2399 = vmatprep.subr.bf16.mxu0 %v2710_v6  ;;  %2420 = vmatpush3.bf16.msra.mxu1 %v2715_v11  ;;  %v2720_v17 = vld [vmem:[#allocation4 + $0x58] sm:$0xff]   ;;  %v2722_v19 = vld [vmem:[#allocation4 + $0xe8] sm:$0xff]   ;;  %v2724_v22 = vld [vmem:[#allocation4 + $0x50] sm:$0xff]   ;;  %v2961_v50 = vmov 11   ;;  %v2962_v51 = vmov 16   ;;  %v2963_v52 = vmov 19  }
  0x2d   :  { %70 = vperm.xlu1 %2677, %v3011_v3   ;;  %83 = vperm.xlu0 %2676, %v3011_v3   ;;  %v2721_v20 = vld [vmem:[#allocation4 + $0x18] sm:$0xff]   ;;  %v2723_v21 = vld [vmem:[#allocation4 + $0xa8] sm:$0xff]   ;;  %v2726_v25 = vld [vmem:[#allocation4 + $0xe0] sm:$0xff]   ;;  %v2964_v53 = vmov 12   ;;  %v2965_v54 = vmov 17   ;;  %v2966_v55 = vmov 18  }
  0x2e   :  { %2421 = vmatprep.subr.bf16.mxu1 %v2718_v15  ;;  %v2725_v26 = vld [vmem:[#allocation4 + $0x10] sm:$0xff]   ;;  %v2727_v27 = vld [vmem:[#allocation4 + $0xa0] sm:$0xff]   ;;  %v2728_v28 = vld [vmem:[#allocation4 + $0x48] sm:$0xff]   ;;  %v3053_v59 = vand.u32 127, %v64_v56  ;;  %v2967_v0 = vmov 1.0|1.0  }
  0x2f   :  { %2400 = vmatpush3.bf16.msra.mxu0 %v2711_v7  ;;  %v2730_v29 = vld [vmem:[#allocation4 + $0xd8] sm:$0xff]   ;;  %v2729_v31 = vld [vmem:[#allocation4 + $0x8] sm:$0xff]   ;;  %v2732_v33 = vld [vmem:[#allocation4 + $0x40] sm:$0xff]  }
  0x30   :  { %2401 = vmatprep.subr.bf16.mxu0 %v2712_v8  ;;  %2422 = vmatpush3.bf16.msra.mxu1 %v2719_v16  ;;  %v2731_v32 = vld [vmem:[#allocation4 + $0x98] sm:$0xff]   ;;  %v2734_v34 = vld [vmem:[#allocation4 + $0xd0] sm:$0xff]   ;;  %v2733_v36 = vld [vmem:[#allocation4] sm:$0xff]  }
  0x31   :  { %2679 = vset.pattern.permute.xlu1 %v2949_v12  ;;  %2678 = vset.pattern.permute.xlu0 %v2949_v12  ;;  %v2735_v37 = vld [vmem:[#allocation4 + $0x90] sm:$0xff]   ;;  %v2736_v38 = vld [vmem:[#allocation4 + $0x178] sm:$0xff]   ;;  %v2737_v39 = vld [vmem:[#allocation4 + $0xc8] sm:$0xff]  }
  0x32   :  { %109 = vperm.xlu1 %2679, %v3011_v3   ;;  %106 = vperm.xlu0 %2678, %v3009_v2   ;;  %v2739_v41 = vld [vmem:[#allocation4 + $0x88] sm:$0xff]   ;;  %v2741_v42 = vld [vmem:[#allocation4 + $0xc0] sm:$0xff]   ;;  %v2746_v46 = vld [vmem:[#allocation4 + $0x1f8] sm:$0xff]  }
  0x33   :  { %2402 = vmatpush3.bf16.msra.mxu0 %v2713_v9  ;;  %2423 = vmatprep.subr.bf16.mxu1 %v2722_v19  ;;  %v2743_v45 = vld [vmem:[#allocation4 + $0x80] sm:$0xff]   ;;  %v2738_v62 = vld [vmem:[#allocation4 + $0x138] sm:$0xff]   ;;  %v2740_v63 = vld [vmem:[#allocation4 + $0x170] sm:$0xff]  }
  0x34   :  { %2403 = vmatprep.subr.bf16.mxu0 %v2716_v13  ;;  %2424 = vmatpush3.bf16.msra.mxu1 %v2723_v21  ;;  %v2744_v4 = vld [vmem:[#allocation4 + $0x168] sm:$0xff]   ;;  %v2747_v6 = vld [vmem:[#allocation4 + $0x1b8] sm:$0xff]   ;;  %v2748_v9 = vld [vmem:[#allocation4 + $0x160] sm:$0xff]  }
  0x35   :  { %2425 = vmatprep.subr.bf16.mxu1 %v2726_v25  ;;  %v2745_v5 = vld [vmem:[#allocation4 + $0x128] sm:$0xff]   ;;  %v2750_v10 = vld [vmem:[#allocation4 + $0x1f0] sm:$0xff]   ;;  %v2749_v11 = vld [vmem:[#allocation4 + $0x120] sm:$0xff]  }
  0x36   :  { %2680 = vset.pattern.permute.xlu1 %v2950_v18  ;;  %2681 = vset.pattern.permute.xlu0 %v2950_v18  ;;  %v2751_v12 = vld [vmem:[#allocation4 + $0x1b0] sm:$0xff]   ;;  %v2752_v13 = vld [vmem:[#allocation4 + $0x158] sm:$0xff]   ;;  %v2754_v15 = vld [vmem:[#allocation4 + $0x1e8] sm:$0xff]  }
  0x37   :  { %93 = vperm.xlu1 %2680, %v3009_v2   ;;  %96 = vperm.xlu0 %2681, %v3011_v3   ;;  %v2753_v16 = vld [vmem:[#allocation4 + $0x118] sm:$0xff]   ;;  %v2756_v18 = vld [vmem:[#allocation4 + $0x150] sm:$0xff]   ;;  %v2786_v56 = vld [vmem:[#allocation4 + $0x2e8] sm:$0xff]  }
  0x38   :  { %2404 = vmatpush3.bf16.msra.mxu0 %v2717_v14  ;;  %2426 = vmatpush3.bf16.msra.mxu1 %v2727_v27  ;;  %v2762_v25 = vld [vmem:[#allocation4 + $0x1d8] sm:$0xff]   ;;  %v2761_v27 = vld [vmem:[#allocation4 + $0x108] sm:$0xff]  }
  0x39   :  { %2405 = vmatprep.subr.bf16.mxu0 %v2720_v17  ;;  %2427 = vmatprep.subr.bf16.mxu1 %v2730_v29  ;;  %v2755_v17 = vld [vmem:[#allocation4 + $0x1a8] sm:$0xff]   ;;  %v2763_v29 = vld [vmem:[#allocation4 + $0x198] sm:$0xff]  }
  0x3b   :  { %2682 = vset.pattern.permute.xlu1 %v2951_v23  ;;  %2683 = vset.pattern.permute.xlu0 %v2952_v24  ;;  %v2759_v23 = vld [vmem:[#allocation4 + $0x1a0] sm:$0xff]  }
  0x3c   :  { %132 = vperm.xlu1 %2682, %v3009_v2   ;;  %119 = vperm.xlu0 %2683, %v3009_v2  }
  0x3d   :  { %2406 = vmatpush3.bf16.msra.mxu0 %v2721_v20  ;;  %2428 = vmatpush3.bf16.msra.mxu1 %v2731_v32  ;;  %v2758_v20 = vld [vmem:[#allocation4 + $0x1e0] sm:$0xff]  }
  0x3e   :  { %2407 = vmatprep.subr.bf16.mxu0 %v2724_v22  ;;  %2429 = vmatprep.subr.bf16.mxu1 %v2734_v34  ;;  %v2757_v22 = vld [vmem:[#allocation4 + $0x110] sm:$0xff]   ;;  %v2765_v32 = vld [vmem:[#allocation4 + $0x100] sm:$0xff]  }
  0x3f   :  { %v2767_v34 = vld [vmem:[#allocation4 + $0x190] sm:$0xff]  }
  0x40   :  { %135 = vperm.xlu1 %2682, %v3011_v3   ;;  %2686 = vset.pattern.permute.xlu0 %v2953_v30 }
  0x41   :  { %161 = vperm.xlu0 %2686, %v3011_v3   ;;  %2408 = vmatpush3.bf16.msra.mxu0 %v2725_v26 }
  0x42   :  { %2409 = vmatprep.subr.bf16.mxu0 %v2728_v28  ;;  %2430 = vmatpush3.bf16.msra.mxu1 %v2735_v37  ;;  %v2770_v37 = vld [vmem:[#allocation4 + $0x238] sm:$0xff]  }
  0x43   :  { %2431 = vmatprep.subr.bf16.mxu1 %v2737_v39  ;;  %v2772_v39 = vld [vmem:[#allocation4 + $0x270] sm:$0xff]  }
  0x44   :  { %2684 = vset.pattern.permute.xlu1 %v2952_v24  ;;  %v2760_v24 = vld [vmem:[#allocation4 + $0x148] sm:$0xff]  }
  0x45   :  { %122 = vperm.xlu1 %2684, %v3011_v3   ;;  %2688 = vset.pattern.permute.xlu0 %v2954_v35 }
  0x46   :  { %184 = vperm.xlu0 %2688, %v3009_v2   ;;  %2410 = vmatpush3.bf16.msra.mxu0 %v2729_v31  ;;  %v2766_v31 = vld [vmem:[#allocation4 + $0x1d0] sm:$0xff]  }
  0x47   :  { %2411 = vmatprep.subr.bf16.mxu0 %v2732_v33  ;;  %2432 = vmatpush3.bf16.msra.mxu1 %v2739_v41 }
  0x48   :  { %2433 = vmatprep.subr.bf16.mxu1 %v2741_v42  ;;  %v2774_v42 = vld [vmem:[#allocation4 + $0x230] sm:$0xff]  }
  0x49   :  { %2685 = vset.pattern.permute.xlu1 %v2953_v30  ;;  %v2764_v30 = vld [vmem:[#allocation4 + $0x140] sm:$0xff]  }
  0x4a   :  { %158 = vperm.xlu1 %2685, %v3009_v2   ;;  %2691 = vset.pattern.permute.xlu0 %v2955_v40 }
  0x4b   :  { %174 = vperm.xlu0 %2691, %v3011_v3   ;;  %2412 = vmatpush3.bf16.msra.mxu0 %v2733_v36  ;;  %v2769_v36 = vld [vmem:[#allocation4 + $0x1c8] sm:$0xff]  }
  0x4c   :  { %2441 = vmatprep.subr.bf16.mxu0 %v2736_v38  ;;  %2434 = vmatpush3.bf16.msra.mxu1 %v2743_v45  ;;  %v2771_v38 = vld [vmem:[#allocation4 + $0x188] sm:$0xff]   ;;  %v2778_v45 = vld [vmem:[#allocation4 + $0x2f8] sm:$0xff]  }
  0x4d   :  { %2463 = vmatprep.subr.bf16.mxu1 %v2746_v46 }
  0x4e   :  { %2687 = vset.pattern.permute.xlu1 %v2956_v43  ;;  %v2775_v43 = vld [vmem:[#allocation4 + $0x180] sm:$0xff]  }
  0x4f   :  { %145 = vperm.xlu1 %2687, %v3009_v2   ;;  %2693 = vset.pattern.permute.xlu0 %v2957_v44 }
  0x50   :  { %197 = vperm.xlu0 %2693, %v3009_v2  }
  0x53   :  { %148 = vperm.xlu1 %2687, %v3011_v3  }
  0x54   :  { %2696 = vset.pattern.permute.xlu0 %v2958_v47 }
  0x55   :  { %239 = vperm.xlu0 %2696, %v3011_v3  }
  0x57   :  { %2689 = vset.pattern.permute.xlu1 %v2954_v35  ;;  %v2768_v35 = vld [vmem:[#allocation4 + $0x278] sm:$0xff]  }
  0x58   :  { %187 = vperm.xlu1 %2689, %v3011_v3  }
  0x59   :  { %2698 = vset.pattern.permute.xlu0 %v2959_v48 }
  0x5a   :  { %262 = vperm.xlu0 %2698, %v3009_v2  }
  0x5c   :  { %2690 = vset.pattern.permute.xlu1 %v2955_v40  ;;  %v2773_v40 = vld [vmem:[#allocation4 + $0x1c0] sm:$0xff]  }
  0x5d   :  { %171 = vperm.xlu1 %2690, %v3009_v2  }
  0x5e   :  { %2701 = vset.pattern.permute.xlu0 %v2960_v49 }
  0x5f   :  { %252 = vperm.xlu0 %2701, %v3011_v3  }
  0x61   :  { %2692 = vset.pattern.permute.xlu1 %v2961_v50  ;;  %v2780_v50 = vld [vmem:[#allocation4 + $0x260] sm:$0xff]  }
  0x62   :  { %210 = vperm.xlu1 %2692, %v3009_v2  }
  0x63   :  { %2703 = vset.pattern.permute.xlu0 %v2962_v51 }
  0x64   :  { %275 = vperm.xlu0 %2703, %v3009_v2  }
  0x66   :  { %213 = vperm.xlu1 %2692, %v3011_v3  }
  0x68   :  { %2706 = vset.pattern.permute.xlu0 %v2963_v52 }
  0x69   :  { %317 = vperm.xlu0 %2706, %v3011_v3  }
  0x6a   :  { %2694 = vset.pattern.permute.xlu1 %v2957_v44  ;;  %v2776_v44 = vld [vmem:[#allocation4 + $0x268] sm:$0xff]  }
  0x6b   :  { %200 = vperm.xlu1 %2694, %v3011_v3  }
  0x6f   :  { %2695 = vset.pattern.permute.xlu1 %v2958_v47 }
  0x70   :  { %236 = vperm.xlu1 %2695, %v3009_v2  }
  0x74   :  { %2697 = vset.pattern.permute.xlu1 %v2964_v53  ;;  %v2781_v53 = vld [vmem:[#allocation4 + $0x220] sm:$0xff]  }
  0x75   :  { %223 = vperm.xlu1 %2697, %v3009_v2  }
  0x79   :  { %226 = vperm.xlu1 %2697, %v3011_v3  }
  0x7d   :  { %2699 = vset.pattern.permute.xlu1 %v2959_v48  ;;  %v2777_v48 = vld [vmem:[#allocation4 + $0x228] sm:$0xff]  }
  0x7e   :  { %265 = vperm.xlu1 %2699, %v3011_v3  }
  0x82   :  { %2700 = vset.pattern.permute.xlu1 %v2960_v49  ;;  %v2779_v49 = vld [vmem:[#allocation4 + $0x2b8] sm:$0xff]  }
  0x83   :  { %249 = vperm.xlu1 %2700, %v3009_v2  }
  0x87   :  { %2702 = vset.pattern.permute.xlu1 %v2965_v54  ;;  %v2783_v54 = vld [vmem:[#allocation4 + $0x2b0] sm:$0xff]  }
  0x88   :  { %288 = vperm.xlu1 %2702, %v3009_v2  }
  0x8c   :  { %291 = vperm.xlu1 %2702, %v3011_v3  }
  0x90   :  { %2704 = vset.pattern.permute.xlu1 %v2962_v51  ;;  %v2782_v51 = vld [vmem:[#allocation4 + $0x2f0] sm:$0xff]  }
  0x91   :  { %278 = vperm.xlu1 %2704, %v3011_v3  }
  0x95   :  { %2705 = vset.pattern.permute.xlu1 %v2963_v52 }
  0x96   :  { %314 = vperm.xlu1 %2705, %v3009_v2  }
  0x9a   :  { %2707 = vset.pattern.permute.xlu1 %v2966_v55  ;;  %v2784_v55 = vld [vmem:[#allocation4 + $0x258] sm:$0xff]  }
  0x9b   :  { %301 = vperm.xlu1 %2707, %v3009_v2  }
  0x9f   :  { %304 = vperm.xlu1 %2707, %v3011_v3   ;;  %v2742_v3 = vld [vmem:[#allocation4 + $0x130] sm:$0xff]  }
  0xa4   :  { %v68_v57 = vpop.permute.xlu1 %67  ;;  %v81_v58 = vpop.permute.xlu0 %80 }
  0xa5   :  { %vm72_vm0 = vcmp.eq.s32.totalorder %v68_v57, %v3053_v59  ;;  %vm85_vm3 = vcmp.eq.s32.totalorder %v81_v58, %v3053_v59  ;;  %v2785_v58 = vld [vmem:[#allocation4 + $0x218] sm:$0xff]  }
  0xa8   :  { %v71_v60 = vpop.permute.xlu1 %70  ;;  %v84_v61 = vpop.permute.xlu0 %83 }
  0xa9   :  { %vm73_vm1 = vcmp.eq.s32.totalorder %v71_v60, %v3053_v59  ;;  %vm86_vm2 = vcmp.eq.s32.totalorder %v84_v61, %v3053_v59  ;;  %v2787_v60 = vld [vmem:[#allocation4 + $0x2a8] sm:$0xff]   ;;  %v2788_v61 = vld [vmem:[#allocation4 + $0x250] sm:$0xff]  }
  0xaa   :  { %vm2350_vm4 = vmpackc.low %vm73_vm1, %vm72_vm0 }
  0xab   :  { %vm2348_vm5 = vmpackc.low %vm86_vm2, %vm85_vm3 }
  0xac   :  { %2349 = vmatprep.mubr.msk.bf16.mxu0 %vm2348_vm5, %v2967_v0 }
  0xad   :  { %2351 = vmatmul.mubr.msk.bf16.vlgmr.msra.gmra.mxu0 %vm2350_vm4, %v2967_v0  ;;  %v110_v1 = vpop.permute.xlu1 %109  ;;  %v107_v2 = vpop.permute.xlu0 %106 }
  0xae   :  { %2442 = vmatpush3.bf16.msra.mxu0 %v2738_v62  ;;  %vm112_vm6 = vcmp.eq.s32.totalorder %v110_v1, %v3053_v59  ;;  %vm111_vm7 = vcmp.eq.s32.totalorder %v107_v2, %v3053_v59  ;;  %v2790_v62 = vld [vmem:[#allocation4 + $0x2e0] sm:$0xff]   ;;  %v2789_v1 = vld [vmem:[#allocation4 + $0x210] sm:$0xff]  }
  0xaf   :  { %2443 = vmatprep.subr.bf16.mxu0 %v2740_v63  ;;  %vm2352_vm8 = vmpackc.low %vm112_vm6, %vm111_vm7  ;;  %v2791_v2 = vld [vmem:[#allocation4 + $0x2a0] sm:$0xff]  }
  0xb0   :  { %2353 = vmatprep.mubr.msk.bf16.mxu1 %vm2352_vm8, %v2967_v0 }
  0xb2   :  { %2444 = vmatpush3.bf16.msra.mxu0 %v2742_v3  ;;  %v94_v7 = vpop.permute.xlu1 %93  ;;  %v97_v8 = vpop.permute.xlu0 %96  ;;  %v2792_v3 = vld [vmem:[#allocation4 + $0x248] sm:$0xff]  }
  0xb3   :  { %vm98_vm9 = vcmp.eq.s32.totalorder %v94_v7, %v3053_v59  ;;  %vm99_vm10 = vcmp.eq.s32.totalorder %v97_v8, %v3053_v59  ;;  %2445 = vmatprep.subr.bf16.mxu0 %v2744_v4  ;;  %v2794_v4 = vld [vmem:[#allocation4 + $0x2d8] sm:$0xff]   ;;  %v2793_v7 = vld [vmem:[#allocation4 + $0x208] sm:$0xff]  }
  0xb4   :  { %vm2354_vm11 = vmpackc.low %vm99_vm10, %vm98_vm9  ;;  %v2795_v8 = vld [vmem:[#allocation4 + $0x298] sm:$0xff]  }
  0xb5   :  { %2355 = vmatmul.mubr.msk.bf16.vlgmr.msra.gmra.mxu1 %vm2354_vm11, %v2967_v0 }
  0xb6   :  { %2446 = vmatpush3.bf16.msra.mxu0 %v2745_v5  ;;  %2464 = vmatpush3.bf16.msra.mxu1 %v2747_v6 }
  0xb7   :  { %v133_v14 = vpop.permute.xlu1 %132  ;;  %2447 = vmatprep.subr.bf16.mxu0 %v2748_v9  ;;  %2465 = vmatprep.subr.bf16.mxu1 %v2750_v10  ;;  %v120_v21 = vpop.permute.xlu0 %119  ;;  %v2796_v9 = vld [vmem:[#allocation4 + $0x240] sm:$0xff]   ;;  %v2798_v10 = vld [vmem:[#allocation4 + $0x2d0] sm:$0xff]  }
  0xb8   :  { %vm137_vm12 = vcmp.eq.s32.totalorder %v133_v14, %v3053_v59  ;;  %vm124_vm2 = vcmp.eq.s32.totalorder %v120_v21, %v3053_v59  ;;  %v2800_v14 = vld [vmem:[#allocation4 + $0x378] sm:$0xff]   ;;  %v2805_v21 = vld [vmem:[#allocation4 + $0x2c0] sm:$0xff]  }
  0xba   :  { %2448 = vmatpush3.bf16.msra.mxu0 %v2749_v11  ;;  %2466 = vmatpush3.bf16.msra.mxu1 %v2751_v12  ;;  %v2797_v12 = vld [vmem:[#allocation4 + $0x200] sm:$0xff]  }
  0xbb   :  { %v136_v19 = vpop.permute.xlu1 %135  ;;  %2449 = vmatprep.subr.bf16.mxu0 %v2752_v13  ;;  %2467 = vmatprep.subr.bf16.mxu1 %v2754_v15  ;;  %v2799_v13 = vld [vmem:[#allocation4 + $0x290] sm:$0xff]   ;;  %v2801_v15 = vld [vmem:[#allocation4 + $0x2c8] sm:$0xff]  }
  0xbc   :  { %vm138_vm13 = vcmp.eq.s32.totalorder %v136_v19, %v3053_v59  ;;  %v162_v28 = vpop.permute.xlu0 %161  ;;  %v2803_v19 = vld [vmem:[#allocation4 + $0x288] sm:$0xff]  }
  0xbd   :  { %vm2356_vm14 = vmpackc.low %vm138_vm13, %vm137_vm12  ;;  %vm164_vm15 = vcmp.eq.s32.totalorder %v162_v28, %v3053_v59  ;;  %v2809_v28 = vld [vmem:[#allocation4 + $0x328] sm:$0xff]  }
  0xbe   :  { %2450 = vmatpush3.bf16.msra.mxu0 %v2753_v16  ;;  %2468 = vmatpush3.bf16.msra.mxu1 %v2755_v17 }
  0xbf   :  { %2357 = vmatprep.mubr.msk.bf16.mxu0 %vm2356_vm14, %v2967_v0  ;;  %2451 = vmatprep.subr.bf16.mxu0 %v2756_v18  ;;  %v2802_v18 = vld [vmem:[#allocation4 + $0x338] sm:$0xff]  }
  0xc0   :  { %2469 = vmatprep.subr.bf16.mxu1 %v2758_v20  ;;  %v123_v26 = vpop.permute.xlu1 %122  ;;  %v2804_v20 = vld [vmem:[#allocation4 + $0x370] sm:$0xff]  }
  0xc1   :  { %vm125_vm1 = vcmp.eq.s32.totalorder %v123_v26, %v3053_v59  ;;  %v185_v47 = vpop.permute.xlu0 %184  ;;  %v2810_v26 = vld [vmem:[#allocation4 + $0x3f8] sm:$0xff]  }
  0xc2   :  { %2452 = vmatpush3.bf16.msra.mxu0 %v2757_v22  ;;  %2470 = vmatpush3.bf16.msra.mxu1 %v2759_v23  ;;  %vm2358_vm4 = vmpackc.low %vm125_vm1, %vm124_vm2  ;;  %vm189_vm7 = vcmp.eq.s32.totalorder %v185_v47, %v3053_v59  ;;  %v2806_v23 = vld [vmem:[#allocation4 + $0x330] sm:$0xff]   ;;  %v2826_v47 = vld [vmem:[#allocation4 + $0x3d8] sm:$0xff]  }
  0xc3   :  { %2453 = vmatprep.subr.bf16.mxu0 %v2760_v24  ;;  %2471 = vmatprep.subr.bf16.mxu1 %v2762_v25  ;;  %v2807_v24 = vld [vmem:[#allocation4 + $0x280] sm:$0xff]   ;;  %v2808_v25 = vld [vmem:[#allocation4 + $0x368] sm:$0xff]  }
  0xc5   :  { %v159_v33 = vpop.permute.xlu1 %158 }
  0xc6   :  { %2454 = vmatpush3.bf16.msra.mxu0 %v2761_v27  ;;  %2472 = vmatpush3.bf16.msra.mxu1 %v2763_v29  ;;  %vm163_vm0 = vcmp.eq.s32.totalorder %v159_v33, %v3053_v59  ;;  %v175_v5 = vpop.permute.xlu0 %174  ;;  %v2811_v29 = vld [vmem:[#allocation4 + $0x3b8] sm:$0xff]  }
  0xc7   :  { %2455 = vmatprep.subr.bf16.mxu0 %v2764_v30  ;;  %2473 = vmatprep.subr.bf16.mxu1 %v2766_v31  ;;  %vm2360_vm3 = vmpackc.low %vm164_vm15, %vm163_vm0  ;;  %vm177_vm15 = vcmp.eq.s32.totalorder %v175_v5, %v3053_v59  ;;  %v2812_v30 = vld [vmem:[#allocation4 + $0x360] sm:$0xff]   ;;  %v2814_v31 = vld [vmem:[#allocation4 + $0x3f0] sm:$0xff]  }
  0xc8   :  { %2361 = vmatprep.mubr.msk.bf16.mxu1 %vm2360_vm3, %v2967_v0  ;;  %v2840_v5 = vld [vmem:[#allocation4 + $0x468] sm:$0xff]  }
  0xca   :  { %2456 = vmatpush3.bf16.msra.mxu0 %v2765_v32  ;;  %2474 = vmatpush3.bf16.msra.mxu1 %v2767_v34  ;;  %v146_v41 = vpop.permute.xlu1 %145  ;;  %v2813_v34 = vld [vmem:[#allocation4 + $0x320] sm:$0xff]  }
  0xcb   :  { %2485 = vmatprep.subr.bf16.mxu0 %v2768_v35  ;;  %2475 = vmatprep.subr.bf16.mxu1 %v2769_v36  ;;  %vm150_vm5 = vcmp.eq.s32.totalorder %v146_v41, %v3053_v59  ;;  %v198_v11 = vpop.permute.xlu0 %197  ;;  %v2815_v35 = vld [vmem:[#allocation4 + $0x3b0] sm:$0xff]   ;;  %v2816_v36 = vld [vmem:[#allocation4 + $0x358] sm:$0xff]  }
  0xcc   :  { %v2820_v41 = vld [vmem:[#allocation4 + $0x350] sm:$0xff]  }
  0xcd   :  { %2359 = vmatmul.mubr.msk.bf16.vlgmr.msra.gmra.mxu0 %vm2358_vm4, %v2967_v0 }
  0xce   :  { %2486 = vmatpush3.bf16.msra.mxu0 %v2770_v37  ;;  %2476 = vmatpush3.bf16.msra.mxu1 %v2771_v38  ;;  %v149_v46 = vpop.permute.xlu1 %148  ;;  %v2818_v37 = vld [vmem:[#allocation4 + $0x3e8] sm:$0xff]  }
  0xcf   :  { %2487 = vmatprep.subr.bf16.mxu0 %v2772_v39  ;;  %2477 = vmatprep.subr.bf16.mxu1 %v2773_v40  ;;  %vm151_vm6 = vcmp.eq.s32.totalorder %v149_v46, %v3053_v59  ;;  %v2817_v39 = vld [vmem:[#allocation4 + $0x318] sm:$0xff]   ;;  %v2819_v40 = vld [vmem:[#allocation4 + $0x3a8] sm:$0xff]  }
  0xd0   :  { %vm2362_vm8 = vmpackc.low %vm151_vm6, %vm150_vm5  ;;  %v240_v17 = vpop.permute.xlu0 %239  ;;  %vm202_vm5 = vcmp.eq.s32.totalorder %v198_v11, %v3053_v59  ;;  %v2824_v46 = vld [vmem:[#allocation4 + $0x348] sm:$0xff]   ;;  %v2844_v11 = vld [vmem:[#allocation4 + $0x460] sm:$0xff]  }
  0xd1   :  { %vm242_vm0 = vcmp.eq.s32.totalorder %v240_v17, %v3053_v59  ;;  %v2849_v17 = vld [vmem:[#allocation4 + $0x418] sm:$0xff]  }
  0xd2   :  { %2488 = vmatpush3.bf16.msra.mxu0 %v2774_v42  ;;  %2478 = vmatpush3.bf16.msra.mxu1 %v2775_v43  ;;  %v2822_v42 = vld [vmem:[#allocation4 + $0x3e0] sm:$0xff]   ;;  %v2821_v43 = vld [vmem:[#allocation4 + $0x310] sm:$0xff]  }
  0xd3   :  { %2489 = vmatprep.subr.bf16.mxu0 %v2776_v44  ;;  %2507 = vmatprep.subr.bf16.mxu1 %v2778_v45  ;;  %v188_v52 = vpop.permute.xlu1 %187  ;;  %v2823_v44 = vld [vmem:[#allocation4 + $0x3a0] sm:$0xff]  }
  0xd4   :  { %vm190_vm9 = vcmp.eq.s32.totalorder %v188_v52, %v3053_v59 }
  0xd5   :  { %2363 = vmatmul.mubr.msk.bf16.vlgmr.msra.gmra.mxu1 %vm2362_vm8, %v2967_v0  ;;  %vm2364_vm10 = vmpackc.low %vm190_vm9, %vm189_vm7  ;;  %v263_v33 = vpop.permute.xlu0 %262 }
  0xd6   :  { %2490 = vmatpush3.bf16.msra.mxu0 %v2777_v48  ;;  %2508 = vmatpush3.bf16.msra.mxu1 %v2779_v49  ;;  %vm267_vm7 = vcmp.eq.s32.totalorder %v263_v33, %v3053_v59  ;;  %v2825_v48 = vld [vmem:[#allocation4 + $0x308] sm:$0xff]   ;;  %v2827_v49 = vld [vmem:[#allocation4 + $0x398] sm:$0xff]  }
  0xd7   :  { %2491 = vmatprep.subr.bf16.mxu0 %v2780_v50  ;;  %2509 = vmatprep.subr.bf16.mxu1 %v2782_v51  ;;  %v2828_v50 = vld [vmem:[#allocation4 + $0x340] sm:$0xff]   ;;  %v2830_v51 = vld [vmem:[#allocation4 + $0x3d0] sm:$0xff]   ;;  %v2865_v33 = vld [vmem:[#allocation4 + $0x488] sm:$0xff]  }
  0xd8   :  { %v172_v57 = vpop.permute.xlu1 %171  ;;  %2365 = vmatprep.mubr.msk.bf16.mxu0 %vm2364_vm10, %v2967_v0 }
  0xd9   :  { %vm176_vm14 = vcmp.eq.s32.totalorder %v172_v57, %v3053_v59  ;;  %v2833_v57 = vld [vmem:[#allocation4 + $0x3c8] sm:$0xff]  }
  0xda   :  { %2492 = vmatpush3.bf16.msra.mxu0 %v2781_v53  ;;  %2510 = vmatpush3.bf16.msra.mxu1 %v2783_v54  ;;  %vm2366_vm1 = vmpackc.low %vm177_vm15, %vm176_vm14  ;;  %v253_v53 = vpop.permute.xlu0 %252  ;;  %v2829_v54 = vld [vmem:[#allocation4 + $0x300] sm:$0xff]  }
  0xdb   :  { %2493 = vmatprep.subr.bf16.mxu0 %v2784_v55  ;;  %2511 = vmatprep.subr.bf16.mxu1 %v2786_v56  ;;  %v2831_v55 = vld [vmem:[#allocation4 + $0x390] sm:$0xff]   ;;  %v2832_v56 = vld [vmem:[#allocation4 + $0x478] sm:$0xff]  }
  0xdd   :  { %v211_v63 = vpop.permute.xlu1 %210 }
  0xde   :  { %2494 = vmatpush3.bf16.msra.mxu0 %v2785_v58  ;;  %2512 = vmatpush3.bf16.msra.mxu1 %v2787_v60  ;;  %vm215_vm11 = vcmp.eq.s32.totalorder %v211_v63, %v3053_v59  ;;  %v2836_v63 = vld [vmem:[#allocation4 + $0x470] sm:$0xff]  }
  0xdf   :  { %2495 = vmatprep.subr.bf16.mxu0 %v2788_v61  ;;  %2513 = vmatprep.subr.bf16.mxu1 %v2790_v62  ;;  %v3105_v60 = vpop.permute.xlu0 %275  ;;  %v2834_v61 = vld [vmem:[#allocation4 + $0x438] sm:$0xff]   ;;  %v2835_v62 = vld [vmem:[#allocation4 + $0x388] sm:$0xff]  }
  0xe1   :  { %v214_v6 = vpop.permute.xlu1 %213 }
  0xe2   :  { %2496 = vmatpush3.bf16.msra.mxu0 %v2789_v1  ;;  %2514 = vmatpush3.bf16.msra.mxu1 %v2791_v2  ;;  %vm216_vm12 = vcmp.eq.s32.totalorder %v214_v6, %v3053_v59  ;;  %v2837_v1 = vld [vmem:[#allocation4 + $0x3c0] sm:$0xff]   ;;  %v2842_v6 = vld [vmem:[#allocation4 + $0x4f8] sm:$0xff]  }
  0xe3   :  { %2497 = vmatprep.subr.bf16.mxu0 %v2792_v3  ;;  %2515 = vmatprep.subr.bf16.mxu1 %v2794_v4  ;;  %vm2368_vm13 = vmpackc.low %vm216_vm12, %vm215_vm11  ;;  %v2838_v3 = vld [vmem:[#allocation4 + $0x430] sm:$0xff]   ;;  %v2839_v4 = vld [vmem:[#allocation4 + $0x380] sm:$0xff]  }
  0xe4   :  { %2369 = vmatprep.mubr.msk.bf16.mxu1 %vm2368_vm13, %v2967_v0 }
  0xe6   :  { %2498 = vmatpush3.bf16.msra.mxu0 %v2793_v7  ;;  %2516 = vmatpush3.bf16.msra.mxu1 %v2795_v8  ;;  %v201_v16 = vpop.permute.xlu1 %200  ;;  %v318_v7 = vpop.permute.xlu0 %317 }
  0xe7   :  { %2499 = vmatprep.subr.bf16.mxu0 %v2796_v9  ;;  %2517 = vmatprep.subr.bf16.mxu1 %v2798_v10  ;;  %vm203_vm4 = vcmp.eq.s32.totalorder %v201_v16, %v3053_v59  ;;  %v2841_v9 = vld [vmem:[#allocation4 + $0x428] sm:$0xff]   ;;  %v2843_v10 = vld [vmem:[#allocation4 + $0x4b8] sm:$0xff]  }
  0xe8   :  { %vm2370_vm6 = vmpackc.low %vm203_vm4, %vm202_vm5  ;;  %vm320_vm4 = vcmp.eq.s32.totalorder %v318_v7, %v3053_v59  ;;  %v2850_v16 = vld [vmem:[#allocation4 + $0x4e8] sm:$0xff]  }
  0xea   :  { %2500 = vmatpush3.bf16.msra.mxu0 %v2797_v12  ;;  %2518 = vmatpush3.bf16.msra.mxu1 %v2799_v13  ;;  %v2846_v12 = vld [vmem:[#allocation4 + $0x4f0] sm:$0xff]   ;;  %v2845_v13 = vld [vmem:[#allocation4 + $0x420] sm:$0xff]  }
  0xeb   :  { %2529 = vmatprep.subr.bf16.mxu0 %v2800_v14  ;;  %2519 = vmatprep.subr.bf16.mxu1 %v2801_v15  ;;  %v237_v22 = vpop.permute.xlu1 %236  ;;  %v2847_v14 = vld [vmem:[#allocation4 + $0x4b0] sm:$0xff]   ;;  %v2848_v15 = vld [vmem:[#allocation4 + $0x458] sm:$0xff]  }
  0xec   :  { %vm241_vm2 = vcmp.eq.s32.totalorder %v237_v22, %v3053_v59  ;;  %v2855_v22 = vld [vmem:[#allocation4 + $0x4a0] sm:$0xff]  }
  0xed   :  { %2367 = vmatmul.mubr.msk.bf16.vlgmr.msra.gmra.mxu0 %vm2366_vm1, %v2967_v0  ;;  %vm2372_vm3 = vmpackc.low %vm242_vm0, %vm241_vm2  ;;  %vm255_vm1 = vcmp.eq.s32.totalorder %v253_v53, %v3053_v59 }
  0xee   :  { %2530 = vmatpush3.bf16.msra.mxu0 %v2802_v18  ;;  %2520 = vmatpush3.bf16.msra.mxu1 %v2803_v19  ;;  %v2851_v18 = vld [vmem:[#allocation4 + $0x4a8] sm:$0xff]   ;;  %v2852_v19 = vld [vmem:[#allocation4 + $0x450] sm:$0xff]  }
  0xef   :  { %2531 = vmatprep.subr.bf16.mxu0 %v2804_v20  ;;  %2521 = vmatprep.subr.bf16.mxu1 %v2805_v21  ;;  %v2854_v20 = vld [vmem:[#allocation4 + $0x4e0] sm:$0xff]   ;;  %v2853_v21 = vld [vmem:[#allocation4 + $0x410] sm:$0xff]  }
  0xf0   :  { %v3092_v27 = vpop.permute.xlu1 %223  ;;  %2373 = vmatprep.mubr.msk.bf16.mxu0 %vm2372_vm3, %v2967_v0 }
  0xf1   :  { %vm228_vm10 = vcmp.eq.s32.totalorder %v3092_v27, %v3053_v59  ;;  %v2860_v27 = vld [vmem:[#allocation4 + $0x440] sm:$0xff]  }
  0xf2   :  { %2532 = vmatpush3.bf16.msra.mxu0 %v2806_v23  ;;  %2522 = vmatpush3.bf16.msra.mxu1 %v2807_v24  ;;  %v2856_v23 = vld [vmem:[#allocation4 + $0x448] sm:$0xff]   ;;  %v2858_v24 = vld [vmem:[#allocation4 + $0x4d8] sm:$0xff]  }
  0xf3   :  { %2533 = vmatprep.subr.bf16.mxu0 %v2808_v25  ;;  %2551 = vmatprep.subr.bf16.mxu1 %v2810_v26  ;;  %v2857_v25 = vld [vmem:[#allocation4 + $0x408] sm:$0xff]   ;;  %v2859_v26 = vld [vmem:[#allocation4 + $0x498] sm:$0xff]  }
  0xf4   :  { %v3096_v32 = vpop.permute.xlu1 %226 }
  0xf5   :  { %2371 = vmatmul.mubr.msk.bf16.vlgmr.msra.gmra.mxu1 %vm2370_vm6, %v2967_v0  ;;  %vm229_vm11 = vcmp.eq.s32.totalorder %v3096_v32, %v3053_v59 }
  0xf6   :  { %2534 = vmatpush3.bf16.msra.mxu0 %v2809_v28  ;;  %2552 = vmatpush3.bf16.msra.mxu1 %v2811_v29  ;;  %vm2374_vm14 = vmpackc.low %vm229_vm11, %vm228_vm10  ;;  %v2862_v28 = vld [vmem:[#allocation4 + $0x4d0] sm:$0xff]   ;;  %v2861_v29 = vld [vmem:[#allocation4 + $0x400] sm:$0xff]  }
  0xf7   :  { %2535 = vmatprep.subr.bf16.mxu0 %v2812_v30  ;;  %2553 = vmatprep.subr.bf16.mxu1 %v2814_v31  ;;  %v2863_v30 = vld [vmem:[#allocation4 + $0x490] sm:$0xff]   ;;  %v2864_v31 = vld [vmem:[#allocation4 + $0x4c8] sm:$0xff]  }
  0xf9   :  { %v266_v38 = vpop.permute.xlu1 %265 }
  0xfa   :  { %2536 = vmatpush3.bf16.msra.mxu0 %v2813_v34  ;;  %2554 = vmatpush3.bf16.msra.mxu1 %v2815_v35  ;;  %vm268_vm8 = vcmp.eq.s32.totalorder %v266_v38, %v3053_v59  ;;  %v2866_v34 = vld [vmem:[#allocation4 + $0x4c0] sm:$0xff]   ;;  %v2968_v38 = vmov 0.0  }
  0xfb   :  { %2537 = vmatprep.subr.bf16.mxu0 %v2816_v36  ;;  %2555 = vmatprep.subr.bf16.mxu1 %v2818_v37  ;;  %vm2376_vm9 = vmpackc.low %vm268_vm8, %vm267_vm7  ;;  %vm280_vm7 = vcmp.eq.s32.totalorder %v3105_v60, %v3053_v59  ;;  %v2867_v36 = vld [vmem:[#allocation4 + $0x480] sm:$0xff]   ;;  %v2868_v37 = vld [vmem:[#allocation6 + $0x38] sm:$0xff]  }
  0xfc   :  { %2377 = vmatprep.mubr.msk.bf16.mxu1 %vm2376_vm9, %v2967_v0 }
  0xfe   :  { %2538 = vmatpush3.bf16.msra.mxu0 %v2817_v39  ;;  %2556 = vmatpush3.bf16.msra.mxu1 %v2819_v40  ;;  %v250_v45 = vpop.permute.xlu1 %249  ;;  %v2869_v39 = vld [vmem:[#allocation6 + $0x30] sm:$0xff]   ;;  %v2870_v40 = vld [vmem:[#allocation6 + $0x28] sm:$0xff]  }
  0xff   :  { %2539 = vmatprep.subr.bf16.mxu0 %v2820_v41  ;;  %2557 = vmatprep.subr.bf16.mxu1 %v2822_v42  ;;  %vm254_vm0 = vcmp.eq.s32.totalorder %v250_v45, %v3053_v59  ;;  %v2871_v41 = vld [vmem:[#allocation6 + $0x20] sm:$0xff]   ;;  %v2872_v42 = vld [vmem:[#allocation6 + $0x18] sm:$0xff]  }
 0x100   :  { %vm2378_vm2 = vmpackc.low %vm255_vm1, %vm254_vm0 }
 0x102   :  { %2540 = vmatpush3.bf16.msra.mxu0 %v2821_v43  ;;  %2558 = vmatpush3.bf16.msra.mxu1 %v2823_v44  ;;  %v2875_v43 = vld [vmem:[#allocation6] sm:$0xff]  }
 0x103   :  { %2541 = vmatprep.subr.bf16.mxu0 %v2824_v46  ;;  %2559 = vmatprep.subr.bf16.mxu1 %v2826_v47  ;;  %v289_v52 = vpop.permute.xlu1 %288 }
 0x104   :  { %vm293_vm12 = vcmp.eq.s32.totalorder %v289_v52, %v3053_v59 }
 0x106   :  { %2542 = vmatpush3.bf16.msra.mxu0 %v2825_v48  ;;  %2560 = vmatpush3.bf16.msra.mxu1 %v2827_v49 }
 0x107   :  { %2543 = vmatprep.subr.bf16.mxu0 %v2828_v50  ;;  %2561 = vmatprep.subr.bf16.mxu1 %v2830_v51  ;;  %v292_v58 = vpop.permute.xlu1 %291 }
 0x108   :  { %vm294_vm13 = vcmp.eq.s32.totalorder %v292_v58, %v3053_v59 }
 0x109   :  { %vm2380_vm15 = vmpackc.low %vm294_vm13, %vm293_vm12  ;;  %vm2969_vm12 = vmmov 0   ;;  %vm2138_vm13 = vcmask 15360  }
 0x10a   :  { %2544 = vmatpush3.bf16.msra.mxu0 %v2829_v54  ;;  %2562 = vmatpush3.bf16.msra.mxu1 %v2831_v55 }
 0x10b   :  { %2573 = vmatprep.subr.bf16.mxu0 %v2832_v56  ;;  %2563 = vmatprep.subr.bf16.mxu1 %v2833_v57 }
 0x10c   :  { %v3109_v2 = vpop.permute.xlu1 %278 }
 0x10d   :  { %2375 = vmatmul.mubr.msk.bf16.vlgmr.msra.gmra.mxu0 %vm2374_vm14, %v2967_v0  ;;  %vm281_vm6 = vcmp.eq.s32.totalorder %v3109_v2, %v3053_v59 }
 0x10e   :  { %2574 = vmatpush3.bf16.msra.mxu0 %v2834_v61  ;;  %2564 = vmatpush3.bf16.msra.mxu1 %v2835_v62  ;;  %vm2382_vm8 = vmpackc.low %vm281_vm6, %vm280_vm7 }
 0x10f   :  { %2575 = vmatprep.subr.bf16.mxu0 %v2836_v63  ;;  %2565 = vmatprep.subr.bf16.mxu1 %v2837_v1 }
 0x110   :  { %2381 = vmatprep.mubr.msk.bf16.mxu0 %vm2380_vm15, %v2967_v0 }
 0x111   :  { %v315_v8 = vpop.permute.xlu1 %314 }
 0x112   :  { %2576 = vmatpush3.bf16.msra.mxu0 %v2838_v3  ;;  %2566 = vmatpush3.bf16.msra.mxu1 %v2839_v4  ;;  %vm319_vm3 = vcmp.eq.s32.totalorder %v315_v8, %v3053_v59 }
 0x113   :  { %2577 = vmatprep.subr.bf16.mxu0 %v2840_v5  ;;  %2595 = vmatprep.subr.bf16.mxu1 %v2842_v6  ;;  %vm2384_vm5 = vmpackc.low %vm320_vm4, %vm319_vm3 }
 0x115   :  { %2379 = vmatmul.mubr.msk.bf16.vlgmr.msra.gmra.mxu1 %vm2378_vm2, %v2967_v0 }
 0x116   :  { %2578 = vmatpush3.bf16.msra.mxu0 %v2841_v9  ;;  %2596 = vmatpush3.bf16.msra.mxu1 %v2843_v10  ;;  %v302_v32 = vpop.permute.xlu1 %301  ;;  %v2187_v9 = vld [vmem:[%s3141_s2] ss:$0 sm:$0xff] }
 0x117   :  { %2579 = vmatprep.subr.bf16.mxu0 %v2844_v11  ;;  %2597 = vmatprep.subr.bf16.mxu1 %v2846_v12  ;;  %vm306_vm9 = vcmp.eq.s32.totalorder %v302_v32, %v3053_v59 }
 0x118   :  { %2385 = vmatprep.mubr.msk.bf16.mxu1 %vm2384_vm5, %v2967_v0 }
 0x11a   :  { %2580 = vmatpush3.bf16.msra.mxu0 %v2845_v13  ;;  %2598 = vmatpush3.bf16.msra.mxu1 %v2847_v14  ;;  %v305_v35 = vpop.permute.xlu1 %304 }
 0x11b   :  { %2581 = vmatprep.subr.bf16.mxu0 %v2848_v15  ;;  %2599 = vmatprep.subr.bf16.mxu1 %v2850_v16  ;;  %vm307_vm10 = vcmp.eq.s32.totalorder %v305_v35, %v3053_v59  ;;  %v2873_v59 = vld [vmem:[#allocation6 + $0x10] sm:$0xff]  }
 0x11c   :  { %vm2386_vm11 = vmpackc.low %vm307_vm10, %vm306_vm9 }
 0x11e   :  { %2582 = vmatpush3.bf16.msra.mxu0 %v2849_v17  ;;  %2600 = vmatpush3.bf16.msra.mxu1 %v2851_v18 }
 0x11f   :  { %2583 = vmatprep.subr.bf16.mxu0 %v2852_v19  ;;  %2601 = vmatprep.subr.bf16.mxu1 %v2854_v20 }
 0x122   :  { %2584 = vmatpush3.bf16.msra.mxu0 %v2853_v21  ;;  %2602 = vmatpush3.bf16.msra.mxu1 %v2855_v22 }
 0x123   :  { %2585 = vmatprep.subr.bf16.mxu0 %v2856_v23  ;;  %2603 = vmatprep.subr.bf16.mxu1 %v2858_v24 }
 0x126   :  { %2586 = vmatpush3.bf16.msra.mxu0 %v2857_v25  ;;  %2604 = vmatpush3.bf16.msra.mxu1 %v2859_v26 }
 0x127   :  { %2587 = vmatprep.subr.bf16.mxu0 %v2860_v27  ;;  %2605 = vmatprep.subr.bf16.mxu1 %v2862_v28 }
 0x12a   :  { %2588 = vmatpush3.bf16.msra.mxu0 %v2861_v29  ;;  %2606 = vmatpush3.bf16.msra.mxu1 %v2863_v30 }
 0x12b   :  { %2607 = vmatprep.subr.bf16.mxu1 %v2864_v31  ;;  %2626 = vmatprep.subr.bf16.mxu0 %v2968_v38 }
 0x12d   :  { %2383 = vmatmul.mubr.msk.bf16.vlgmr.msra.gmra.mxu0 %vm2382_vm8, %v2967_v0 }
 0x12e   :  { %2608 = vmatpush3.bf16.msra.mxu1 %v2865_v33  ;;  %2627 = vmatpush3.bf16.msra.mxu0 %v2868_v37 }
 0x12f   :  { %2609 = vmatprep.subr.bf16.mxu1 %v2866_v34  ;;  %2628 = vmatprep.subr.bf16.mxu0 %v2968_v38 }
 0x130   :  { %2642 = vmatprep.mubr.msk.bf16.mxu0 %vm2969_vm12, %v2968_v38 }
 0x132   :  { %2610 = vmatpush3.bf16.msra.mxu1 %v2867_v36  ;;  %2629 = vmatpush3.bf16.msra.mxu0 %v2869_v39 }
 0x133   :  { %2630 = vmatprep.subr.bf16.mxu0 %v2968_v38 }
 0x135   :  { %2387 = vmatmul.mubr.msk.bf16.vlgmr.msra.gmra.mxu1 %vm2386_vm11, %v2967_v0  ;;  %v2874_v0 = vld [vmem:[#allocation6 + $0x8] sm:$0xff]  }
 0x136   :  { %2631 = vmatpush3.bf16.msra.mxu0 %v2870_v40 }
 0x137   :  { %2632 = vmatprep.subr.bf16.mxu0 %v2968_v38 }
 0x13a   :  { %2633 = vmatpush3.bf16.msra.mxu0 %v2871_v41 }
 0x13b   :  { %2634 = vmatprep.subr.bf16.mxu0 %v2968_v38 }
 0x13e   :  { %2635 = vmatpush3.bf16.msra.mxu0 %v2872_v42 }
 0x13f   :  { %2636 = vmatprep.subr.bf16.mxu0 %v2968_v38 }
 0x142   :  { %2637 = vmatpush3.bf16.msra.mxu0 %v2873_v59 }
 0x143   :  { %2638 = vmatprep.subr.bf16.mxu0 %v2968_v38 }
 0x146   :  { %2639 = vmatpush3.bf16.msra.mxu0 %v2874_v0 }
 0x147   :  { %2640 = vmatprep.subr.bf16.mxu0 %v2968_v38 }
 0x14a   :  { %2641 = vmatpush3.bf16.msra.mxu0 %v2875_v43 }
 0x16d   :  { %v2413_v44 = vpop.f32.mrf.mxu0 }
 0x16f   :  { %v2414_v45 = vpop.f32.mrf.mxu0 }
 0x170   :  { %v2415_v8 = vadd.f32 %v2414_v45, %v2413_v44 }
 0x171   :  { %v2416_v46 = vpop.f32.mrf.mxu0 }
 0x172   :  { %v1648_v14 = vadd.f32 %v2415_v8, %v2187_v9 }
 0x173   :  { %v2417_v48 = vpop.f32.mrf.mxu0 }
 0x174   :  { %v2418_v12 = vadd.f32 %v2417_v48, %v2416_v46 }
 0x175   :  { %v2435_v47 = vpop.f32.mrf.mxu1 }
 0x176   :  { %v1651_v19 = vadd.f32 %v2418_v12, %v2187_v9 }
 0x177   :  { %v2436_v49 = vpop.f32.mrf.mxu1 }
 0x178   :  { %v2437_v13 = vadd.f32 %v2436_v49, %v2435_v47 }
 0x179   :  { %v2438_v51 = vpop.f32.mrf.mxu1 }
 0x17a   :  { %v1689_v20 = vadd.f32 %v2437_v13, %v1648_v14 }
 0x17b   :  { %v2439_v53 = vpop.f32.mrf.mxu1 }
 0x17c   :  { %v2440_v15 = vadd.f32 %v2439_v53, %v2438_v51 }
 0x17e   :  { %v1692_v24 = vadd.f32 %v2440_v15, %v1651_v19 }
 0x18d   :  { %v2457_v50 = vpop.f32.mrf.mxu0 }
 0x18f   :  { %v2458_v52 = vpop.f32.mrf.mxu0 }
 0x190   :  { %v2459_v16 = vadd.f32 %v2458_v52, %v2457_v50 }
 0x191   :  { %v2460_v54 = vpop.f32.mrf.mxu0 }
 0x192   :  { %v1730_v25 = vadd.f32 %v2459_v16, %v1689_v20 }
 0x193   :  { %v2461_v56 = vpop.f32.mrf.mxu0 }
 0x194   :  { %v2462_v21 = vadd.f32 %v2461_v56, %v2460_v54 }
 0x195   :  { %v2479_v55 = vpop.f32.mrf.mxu1 }
 0x196   :  { %v1733_v30 = vadd.f32 %v2462_v21, %v1692_v24 }
 0x197   :  { %v2480_v57 = vpop.f32.mrf.mxu1 }
 0x198   :  { %v2481_v22 = vadd.f32 %v2480_v57, %v2479_v55 }
 0x199   :  { %v2482_v60 = vpop.f32.mrf.mxu1 }
 0x19a   :  { %v1771_v31 = vadd.f32 %v2481_v22, %v1730_v25 }
 0x19b   :  { %v2483_v62 = vpop.f32.mrf.mxu1 }
 0x19c   :  { %v2484_v26 = vadd.f32 %v2483_v62, %v2482_v60 }
 0x19e   :  { %v1774_v35 = vadd.f32 %v2484_v26, %v1733_v30 }
 0x1ad   :  { %v2501_v58 = vpop.f32.mrf.mxu0 }
 0x1af   :  { %v2502_v61 = vpop.f32.mrf.mxu0 }
 0x1b0   :  { %v2503_v27 = vadd.f32 %v2502_v61, %v2501_v58 }
 0x1b1   :  { %v2504_v63 = vpop.f32.mrf.mxu0 }
 0x1b2   :  { %v1812_v36 = vadd.f32 %v2503_v27, %v1771_v31 }
 0x1b3   :  { %v2505_v2 = vpop.f32.mrf.mxu0 }
 0x1b4   :  { %v2506_v32 = vadd.f32 %v2505_v2, %v2504_v63  ;;  %v2388_v2 = vld [vmem:[%s3143_s4] ss:$0 sm:$0xff] }
 0x1b5   :  { %v2523_v1 = vpop.f32.mrf.mxu1 }
 0x1b6   :  { %v1815_v40 = vadd.f32 %v2506_v32, %v1774_v35 }
 0x1b7   :  { %v2524_v3 = vpop.f32.mrf.mxu1 }
 0x1b8   :  { %v2525_v33 = vadd.f32 %v2524_v3, %v2523_v1 }
 0x1b9   :  { %v2526_v5 = vpop.f32.mrf.mxu1 }
 0x1ba   :  { %v1853_v41 = vadd.f32 %v2525_v33, %v1812_v36 }
 0x1bb   :  { %v2527_v7 = vpop.f32.mrf.mxu1 }
 0x1bc   :  { %v2528_v37 = vadd.f32 %v2527_v7, %v2526_v5 }
 0x1be   :  { %v1856_v44 = vadd.f32 %v2528_v37, %v1815_v40 }
 0x1cd   :  { %v2545_v4 = vpop.f32.mrf.mxu0 }
 0x1cf   :  { %v2546_v6 = vpop.f32.mrf.mxu0 }
 0x1d0   :  { %v2547_v38 = vadd.f32 %v2546_v6, %v2545_v4 }
 0x1d1   :  { %v2548_v10 = vpop.f32.mrf.mxu0 }
 0x1d2   :  { %v1894_v45 = vadd.f32 %v2547_v38, %v1853_v41 }
 0x1d3   :  { %v2549_v17 = vpop.f32.mrf.mxu0 }
 0x1d4   :  { %v2550_v42 = vadd.f32 %v2549_v17, %v2548_v10 }
 0x1d5   :  { %v2567_v11 = vpop.f32.mrf.mxu1 }
 0x1d6   :  { %v1897_v49 = vadd.f32 %v2550_v42, %v1856_v44 }
 0x1d7   :  { %v2568_v18 = vpop.f32.mrf.mxu1 }
 0x1d8   :  { %v2569_v59 = vadd.f32 %v2568_v18, %v2567_v11 }
 0x1d9   :  { %v2570_v28 = vpop.f32.mrf.mxu1 }
 0x1da   :  { %v1935_v50 = vadd.f32 %v2569_v59, %v1894_v45 }
 0x1db   :  { %v2571_v39 = vpop.f32.mrf.mxu1 }
 0x1dc   :  { %v2572_v46 = vadd.f32 %v2571_v39, %v2570_v28 }
 0x1de   :  { %v1938_v54 = vadd.f32 %v2572_v46, %v1897_v49 }
 0x1ed   :  { %v2589_v23 = vpop.f32.mrf.mxu0 }
 0x1ef   :  { %v2590_v29 = vpop.f32.mrf.mxu0 }
 0x1f0   :  { %v2591_v47 = vadd.f32 %v2590_v29, %v2589_v23 }
 0x1f1   :  { %v2592_v34 = vpop.f32.mrf.mxu0 }
 0x1f2   :  { %v1976_v55 = vadd.f32 %v2591_v47, %v1935_v50 }
 0x1f3   :  { %v2593_v0 = vpop.f32.mrf.mxu0 }
 0x1f4   :  { %v2594_v51 = vadd.f32 %v2593_v0, %v2592_v34 }
 0x1f5   :  { %v2611_v43 = vpop.f32.mrf.mxu1 }
 0x1f6   :  { %v1979_v57 = vadd.f32 %v2594_v51, %v1938_v54 }
 0x1f7   :  { %v2612_v48 = vpop.f32.mrf.mxu1 }
 0x1f8   :  { %v2613_v52 = vadd.f32 %v2612_v48, %v2611_v43 }
 0x1f9   :  { %v2614_v53 = vpop.f32.mrf.mxu1 }
 0x1fa   :  { %v2017_v58 = vadd.f32 %v2613_v52, %v1976_v55 }
 0x1fb   :  { %v2615_v56 = vpop.f32.mrf.mxu1 }
 0x1fc   :  { %v2616_v60 = vadd.f32 %v2615_v56, %v2614_v53  ;;  %v2023_v62 = vmax.f32 %v2017_v58, 0.0 }
 0x1fe   :  { %v2020_v61 = vadd.f32 %v2616_v60, %v1979_v57 }
 0x200   :  { %v2024_v63 = vmax.f32 %v2020_v61, 0.0 }
 0x202   :  { %v2025_v1 = vpack.c.bf16 %v2024_v63, %v2023_v62 }
 0x204   :  { %2643 = vmatmul.mubr.bf16.vlgmr.msra.gmra.mxu0 %v2025_v1 }
 0x2c4   :  { %v2131_v3 = vpop.f32.mrf.mxu0 }
 0x2c5   :  { %v2132_v4 = vadd.f32 %v2388_v2, %v2131_v3 }
 0x2c6   :  { %v2644_v5 = vpop.f32.mrf.mxu0 }
 0x2c7   :  { %2139 = vst.msk [vmem:[%s3144_s5] sm:$0xff] %vm2138_vm13, %v2132_v4 }
 0x2c8   :  { %v2134_v6 = vpop.f32.mrf.mxu0 }
 0x2c9   :  { %v2135_v7 = vadd.f32 %v2388_v2, %v2134_v6 }
 0x2ca   :  { %v2645_v8 = vpop.f32.mrf.mxu0 }
 0x2cb   :  { %2140 = vst.msk [vmem:[%s3144_s5 + $0x8] sm:$0xff] %vm2138_vm13, %v2135_v7 }
 0x2cc   :  { %2145 = vsyncpa [#allocation3], 1 }
 0x2cd   :  { %2146 = vsyncpa [#allocation5], 1 }

</bundles_post_ra>
